<compile_context>
chip_gen: v7x
topology: tpu7x:2x2x1
jax: 0.10.0
libtpu: 0.0.40
codegen_flags: <defaults>
</compile_context>

<pallas_src>
import functools
import math

import jax
import jax.numpy as jnp
from jax import lax
from jax.experimental import pallas as pl
from jax.experimental.pallas import tpu as pltpu


def _memory_core_kernel(m_ref, qi_ref, mo_ref, qo_ref, p_ref, mem_ref, *,
                        t_steps, scale):
    # m_ref  : (1, T, D_e, S_m)     keys, un-transposed reshape of m_in
    # qi_ref : (1, D_e, ts)         query-column tile (lane-dense)
    # mo_ref : (1, D_o, N)          values (raw reinterpret of m_out, = torch .view)
    # qo_ref : (1, D_q, ts)         q_out tile (fused concat)
    # p_ref  : (1, N, ts)   bf16    attention output
    # mem_ref: (1, D_o+D_q, ts) f32 fused [mem ; q_out] output

    # Fold 1/sqrt(D_e) into the small (D_e, ts) operand, cast to bf16 for MXU.
    qi = (qi_ref[0] * scale).astype(jnp.bfloat16)          # (D_e, ts)
    m_all = m_ref[0].astype(jnp.bfloat16)                  # (T, D_e, S_m)

    # scores[t*S_m + sm, sq] = sum_e m_in[t, e, sm] * qi[e, sq]
    # T small static trans-A matmuls keep m_in lane-dense (no wrapper transpose).
    blocks = []
    for t in range(t_steps):
        blocks.append(
            lax.dot_general(m_all[t], qi, (((0,), (0,)), ((), ())),
                            preferred_element_type=jnp.float32))   # (S_m, ts)
    scores = blocks[0] if t_steps == 1 else jnp.concatenate(blocks, axis=0)

    # Softmax over N (torch softmax dim=1 of (B, N, S)); f32 VPU/EUP math.
    mmax = jnp.max(scores, axis=0, keepdims=True)          # (1, ts)
    e = jnp.exp(scores - mmax)                             # (N, ts)
    denom = jnp.sum(e, axis=0, keepdims=True)              # (1, ts)
    p = e * pl.reciprocal(denom, approx=True)              # (N, ts) f32

    p_bf16 = p.astype(p_ref.dtype)
    p_ref[0] = p_bf16                                      # bf16 writeback

    # mem[do, sq] = sum_n mo[do, n] * p[n, sq]  (bf16 MXU, f32 accumulation)
    mo = mo_ref[0].astype(jnp.bfloat16)                    # (D_o, N)
    mem = jnp.dot(mo, p_bf16, preferred_element_type=jnp.float32)  # (D_o, ts)

    # Fused channel concat: rows [0:D_o] = mem, rows [D_o:] = q_out tile.
    mem_ref[0] = jnp.concatenate(
        [mem.astype(mem_ref.dtype), qo_ref[0].astype(mem_ref.dtype)], axis=0)


def _vmem_block_estimate(T, D_e, D_o, D_q, N, Sm, block_s):
    """Rough per-grid-step VMEM footprint (double-buffered I/O + temporaries)."""
    f32, bf16 = 4, 2
    in_b = (T * D_e * Sm + D_e * block_s + D_o * N + D_q * block_s) * f32
    out_b = N * block_s * bf16 + (D_o + D_q) * block_s * f32
    # in-kernel temporaries: scores / e / p f32 + p bf16 + bf16 operand copies
    tmp_b = N * block_s * (3 * f32 + bf16) + (T * D_e * Sm + D_o * N) * bf16
    return 2 * (in_b + out_b) + tmp_b


def memory_core_forward(m_in, m_out, q_in, q_out, *, block_s=128,
                        p_dtype=jnp.bfloat16):
    """MemoryCore.forward (eval mode) via a single fused Pallas kernel."""
    B, T, D_e, H, W = m_in.shape
    _, _, D_o, _, _ = m_out.shape
    _, D_q, _, _ = q_out.shape
    N = T * H * W
    S = H * W          # query columns
    Sm = H * W         # key spatial positions per memory frame

    # S-tile that divides S (fall back to whole-S block for awkward shapes),
    # shrunk while the per-block VMEM estimate exceeds the budget.
    block_s = min(block_s, S)
    if S % block_s != 0:
        block_s = S
    vmem_budget = 40 * 1024 * 1024
    est = functools.partial(_vmem_block_estimate, T, D_e, D_o, D_q, N, Sm)
    while (est(block_s) > vmem_budget and block_s > 128 and block_s % 2 == 0):
        block_s //= 2
    n_s = S // block_s

    # Pure reshapes only — no HBM transpose pass.
    m_keys = m_in.reshape(B, T, D_e, Sm)     # keys, un-transposed
    qi = q_in.reshape(B, D_e, S)             # queries
    # Raw row-major reinterpret of (B, T, D_o, H, W), faithfully matching the
    # PyTorch `m_out.view(B, D_o, T*H*W)` quirk (interleaves T and D_o).
    mo = m_out.reshape(B, D_o, N)
    qo = q_out.reshape(B, D_q, S)

    vmem_limit = max(32 * 1024 * 1024,
                     min(int(1.5 * est(block_s)), 48 * 1024 * 1024))

    kernel = functools.partial(_memory_core_kernel, t_steps=T,
                               scale=1.0 / math.sqrt(D_e))

    p, mem_cat = pl.pallas_call(
        kernel,
        out_shape=(
            jax.ShapeDtypeStruct((B, N, S), p_dtype),
            jax.ShapeDtypeStruct((B, D_o + D_q, S), jnp.float32),
        ),
        grid_spec=pltpu.PrefetchScalarGridSpec(
            num_scalar_prefetch=0,
            grid=(B, n_s),
            in_specs=[
                pl.BlockSpec((1, T, D_e, Sm), lambda b, j: (b, 0, 0, 0)),
                pl.BlockSpec((1, D_e, block_s), lambda b, j: (b, 0, j)),
                pl.BlockSpec((1, D_o, N), lambda b, j: (b, 0, 0)),
                pl.BlockSpec((1, D_q, block_s), lambda b, j: (b, 0, j)),
            ],
            out_specs=[
                pl.BlockSpec((1, N, block_s), lambda b, j: (b, 0, j)),
                pl.BlockSpec((1, D_o + D_q, block_s), lambda b, j: (b, 0, j)),
            ],
        ),
        compiler_params=pltpu.CompilerParams(
            dimension_semantics=("parallel", "parallel"),
            vmem_limit_bytes=vmem_limit,
        ),
    )(m_keys, qi, mo, qo)

    mem_out = mem_cat.reshape(B, D_o + D_q, H, W)
    return mem_out, p


def _reference_forward(m_in, m_out, q_in, q_out):
    """Pure-JAX f32 reference mirroring the torch code, for verification."""
    B, T, D_e, H, W = m_in.shape
    _, _, D_o, _, _ = m_out.shape
    N, S = T * H * W, H * W
    mi = jnp.transpose(m_in, (0, 1, 3, 4, 2)).reshape(B, N, D_e)
    qi = q_in.reshape(B, D_e, S)
    p = jnp.einsum("bne,bes->bns", mi, qi) / math.sqrt(D_e)
    p = jax.nn.softmax(p, axis=1)
    mo = m_out.reshape(B, D_o, N)
    mem = jnp.einsum("bdn,bns->bds", mo, p).reshape(B, D_o, H, W)
    return jnp.concatenate([mem, q_out], axis=1), p


if __name__ == "__main__":
    # Small, MemoryCore-consistent shapes.
    B, T, D_e, D_o, D_q, H, W = 2, 2, 8, 8, 4, 16, 16

    key = jax.random.PRNGKey(0)
    k1, k2, k3, k4 = jax.random.split(key, 4)
    m_in = jax.random.normal(k1, (B, T, D_e, H, W), dtype=jnp.float32)
    m_out = jax.random.normal(k2, (B, T, D_o, H, W), dtype=jnp.float32)
    q_in = jax.random.normal(k3, (B, D_e, H, W), dtype=jnp.float32)
    q_out = jax.random.normal(k4, (B, D_q, H, W), dtype=jnp.float32)

    mem_out, p = jax.jit(memory_core_forward)(m_in, m_out, q_in, q_out)
    jax.block_until_ready((mem_out, p))

    ref_mem_out, ref_p = _reference_forward(m_in, m_out, q_in, q_out)
    assert mem_out.shape == (B, D_o + D_q, H, W)
    assert p.shape == (B, T * H * W, H * W)
    assert p.dtype == jnp.bfloat16
    # bf16 MXU operands + bf16 p writeback -> bf16-appropriate tolerances.
    assert jnp.allclose(mem_out, ref_mem_out, atol=3e-2, rtol=3e-2)
    assert jnp.allclose(p.astype(jnp.float32), ref_p, atol=1e-2)

    print("KERNEL_OK")
</pallas_src>

<mosaic_0001>
module attributes {stable_mosaic.version = 11 : i64} {
  func.func @_memory_core_kernel(%arg0: i32, %arg1: i32, %arg2: memref<1x2x8x256xf32, #tpu.memory_space<vmem>>, %arg3: memref<1x8x128xf32, #tpu.memory_space<vmem>>, %arg4: memref<1x8x512xf32, #tpu.memory_space<vmem>>, %arg5: memref<1x4x128xf32, #tpu.memory_space<vmem>>, %arg6: memref<1x512x128xbf16, #tpu.memory_space<vmem>>, %arg7: memref<1x12x128xf32, #tpu.memory_space<vmem>>) attributes {dimension_semantics = [#tpu.dimension_semantics<parallel>, #tpu.dimension_semantics<parallel>], iteration_bounds = array<i64: 2, 2>, scalar_prefetch = 0 : i64, scratch_operands = 0 : i64, tpu.core_type = #tpu.core_type<tc>, window_params = [{transform_indices = @transform_0, window_bounds = array<i64: 1, 2, 8, 256>}, {transform_indices = @transform_1, window_bounds = array<i64: 1, 8, 128>}, {transform_indices = @transform_2, window_bounds = array<i64: 1, 8, 512>}, {transform_indices = @transform_3, window_bounds = array<i64: 1, 4, 128>}, {transform_indices = @transform_4, window_bounds = array<i64: 1, 512, 128>}, {transform_indices = @transform_5, window_bounds = array<i64: 1, 12, 128>}]} {
    %c0 = arith.constant 0 : index
    %c0_0 = arith.constant 0 : index
    %c0_1 = arith.constant 0 : index
    %0 = vector.load %arg3[%c0, %c0_0, %c0_1] : memref<1x8x128xf32, #tpu.memory_space<vmem>>, vector<1x8x128xf32>
    %1 = vector.shape_cast %0 : vector<1x8x128xf32> to vector<8x128xf32>
    %cst = arith.constant 0.353553385 : f32
    %2 = vector.broadcast %cst : f32 to vector<8x128xf32>
    %3 = arith.mulf %1, %2 : vector<8x128xf32>
    %4 = arith.truncf %3 : vector<8x128xf32> to vector<8x128xbf16>
    %c0_2 = arith.constant 0 : index
    %c0_3 = arith.constant 0 : index
    %c0_4 = arith.constant 0 : index
    %c0_5 = arith.constant 0 : index
    %5 = vector.load %arg2[%c0_2, %c0_3, %c0_4, %c0_5] : memref<1x2x8x256xf32, #tpu.memory_space<vmem>>, vector<1x2x8x256xf32>
    %6 = vector.shape_cast %5 : vector<1x2x8x256xf32> to vector<2x8x256xf32>
    %7 = arith.truncf %6 : vector<2x8x256xf32> to vector<2x8x256xbf16>
    %8 = vector.extract_strided_slice %7 {offsets = [0, 0, 0], sizes = [1, 8, 256], strides = [1, 1, 1]} : vector<2x8x256xbf16> to vector<1x8x256xbf16>
    %9 = vector.shape_cast %8 : vector<1x8x256xbf16> to vector<8x256xbf16>
    %cst_6 = arith.constant dense<0.000000e+00> : vector<256x128xf32>
    %10 = tpu.matmul %9, %4, %cst_6 {dimension_numbers = #tpu.dot_dimension_numbers<[0], [0], [1], [1], [0, 1, 1, 1], [], []>} : vector<8x256xbf16>, vector<8x128xbf16>, vector<256x128xf32> -> vector<256x128xf32>
    %11 = vector.extract_strided_slice %7 {offsets = [1, 0, 0], sizes = [1, 8, 256], strides = [1, 1, 1]} : vector<2x8x256xbf16> to vector<1x8x256xbf16>
    %12 = vector.shape_cast %11 : vector<1x8x256xbf16> to vector<8x256xbf16>
    %cst_7 = arith.constant dense<0.000000e+00> : vector<256x128xf32>
    %13 = tpu.matmul %12, %4, %cst_7 {dimension_numbers = #tpu.dot_dimension_numbers<[0], [0], [1], [1], [0, 1, 1, 1], [], []>} : vector<8x256xbf16>, vector<8x128xbf16>, vector<256x128xf32> -> vector<256x128xf32>
    %14 = tpu.concatenate %10, %13 in 0 : vector<256x128xf32>, vector<256x128xf32> -> vector<512x128xf32>
    %cst_8 = arith.constant dense<0xFF800000> : vector<128xf32>
    %15 = vector.multi_reduction <maximumf>, %14, %cst_8 [0] : vector<512x128xf32> to vector<128xf32>
    %16 = vector.shape_cast %15 : vector<128xf32> to vector<1x128xf32>
    %17 = vector.broadcast %16 : vector<1x128xf32> to vector<512x128xf32>
    %18 = arith.subf %14, %17 : vector<512x128xf32>
    %19 = math.exp %18 : vector<512x128xf32>
    %cst_9 = arith.constant dense<0.000000e+00> : vector<128xf32>
    %20 = vector.multi_reduction <add>, %19, %cst_9 [0] : vector<512x128xf32> to vector<128xf32>
    %21 = vector.shape_cast %20 : vector<128xf32> to vector<1x128xf32>
    %22 = tpu.reciprocal %21 {approx = true} : vector<1x128xf32> -> vector<1x128xf32>
    %23 = vector.broadcast %22 : vector<1x128xf32> to vector<512x128xf32>
    %24 = arith.mulf %19, %23 : vector<512x128xf32>
    %25 = arith.truncf %24 : vector<512x128xf32> to vector<512x128xbf16>
    %c0_10 = arith.constant 0 : index
    %c0_11 = arith.constant 0 : index
    %c0_12 = arith.constant 0 : index
    %26 = vector.load %arg6[%c0_10, %c0_11, %c0_12] : memref<1x512x128xbf16, #tpu.memory_space<vmem>>, vector<1x512x128xbf16>
    %27 = vector.shape_cast %26 : vector<1x512x128xbf16> to vector<512x128xbf16>
    %28 = vector.shape_cast %25 : vector<512x128xbf16> to vector<1x512x128xbf16>
    tpu.vector_store %arg6[%c0_10, %c0_11, %c0_12], %28 {strides = array<i32>} : memref<1x512x128xbf16, #tpu.memory_space<vmem>>, vector<1x512x128xbf16>,
    %c0_13 = arith.constant 0 : index
    %c0_14 = arith.constant 0 : index
    %c0_15 = arith.constant 0 : index
    %29 = vector.load %arg4[%c0_13, %c0_14, %c0_15] : memref<1x8x512xf32, #tpu.memory_space<vmem>>, vector<1x8x512xf32>
    %30 = vector.shape_cast %29 : vector<1x8x512xf32> to vector<8x512xf32>
    %31 = arith.truncf %30 : vector<8x512xf32> to vector<8x512xbf16>
    %cst_16 = arith.constant dense<0.000000e+00> : vector<8x128xf32>
    %32 = tpu.matmul %31, %25, %cst_16 {dimension_numbers = #tpu.dot_dimension_numbers<[1], [0], [0], [1], [0, 0, 1, 1], [], []>} : vector<8x512xbf16>, vector<512x128xbf16>, vector<8x128xf32> -> vector<8x128xf32>
    %c0_17 = arith.constant 0 : index
    %c0_18 = arith.constant 0 : index
    %c0_19 = arith.constant 0 : index
    %33 = vector.load %arg5[%c0_17, %c0_18, %c0_19] : memref<1x4x128xf32, #tpu.memory_space<vmem>>, vector<1x4x128xf32>
    %34 = vector.shape_cast %33 : vector<1x4x128xf32> to vector<4x128xf32>
    %35 = tpu.concatenate %32, %34 in 0 : vector<8x128xf32>, vector<4x128xf32> -> vector<12x128xf32>
    %c0_20 = arith.constant 0 : index
    %c0_21 = arith.constant 0 : index
    %c0_22 = arith.constant 0 : index
    %36 = vector.load %arg7[%c0_20, %c0_21, %c0_22] : memref<1x12x128xf32, #tpu.memory_space<vmem>>, vector<1x12x128xf32>
    %37 = vector.shape_cast %36 : vector<1x12x128xf32> to vector<12x128xf32>
    %38 = vector.shape_cast %35 : vector<12x128xf32> to vector<1x12x128xf32>
    tpu.vector_store %arg7[%c0_20, %c0_21, %c0_22], %38 {strides = array<i32>} : memref<1x12x128xf32, #tpu.memory_space<vmem>>, vector<1x12x128xf32>,
    return
  }
  func.func @transform_0(%arg0: i32, %arg1: i32) -> (i32, i32, i32, i32) {
    %c0_i32 = arith.constant 0 : i32
    %c0_i32_0 = arith.constant 0 : i32
    %c0_i32_1 = arith.constant 0 : i32
    %c0_i32_2 = arith.constant 0 : i32
    return %arg0, %c0_i32, %c0_i32_0, %c0_i32_1 : i32, i32, i32, i32
  }
  func.func @transform_1(%arg0: i32, %arg1: i32) -> (i32, i32, i32) {
    %c0_i32 = arith.constant 0 : i32
    %c0_i32_0 = arith.constant 0 : i32
    return %arg0, %c0_i32, %arg1 : i32, i32, i32
  }
  func.func @transform_2(%arg0: i32, %arg1: i32) -> (i32, i32, i32) {
    %c0_i32 = arith.constant 0 : i32
    %c0_i32_0 = arith.constant 0 : i32
    %c0_i32_1 = arith.constant 0 : i32
    return %arg0, %c0_i32, %c0_i32_0 : i32, i32, i32
  }
  func.func @transform_3(%arg0: i32, %arg1: i32) -> (i32, i32, i32) {
    %c0_i32 = arith.constant 0 : i32
    %c0_i32_0 = arith.constant 0 : i32
    return %arg0, %c0_i32, %arg1 : i32, i32, i32
  }
  func.func @transform_4(%arg0: i32, %arg1: i32) -> (i32, i32, i32) {
    %c0_i32 = arith.constant 0 : i32
    %c0_i32_0 = arith.constant 0 : i32
    return %arg0, %c0_i32, %arg1 : i32, i32, i32
  }
  func.func @transform_5(%arg0: i32, %arg1: i32) -> (i32, i32, i32) {
    %c0_i32 = arith.constant 0 : i32
    %c0_i32_0 = arith.constant 0 : i32
    return %arg0, %c0_i32, %arg1 : i32, i32, i32
  }
}

</mosaic_0001>

<bundles_post_ra>
// kernel: memory_core_forward.1
= control target key start
LH: loop header
LB: loop body
LE: loop exit
PB: predicated region body
PF: predicated region fallthrough
CT: control target
= control target key end

     0   :  { %s3790_s0 = inlined_call_operand.vmem [shape: f32[2,2,8,256], index: 0, kind: input, shape index: {}]   ;;  %s3791_s1 = inlined_call_operand.vmem [shape: f32[2,8,256], index: 1, kind: input, shape index: {}]   ;;  %s3792_s2 = inlined_call_operand.vmem [shape: f32[2,8,512], index: 2, kind: input, shape index: {}]   ;;  %s3793_s3 = inlined_call_operand.vmem [shape: f32[2,4,256], index: 3, kind: input, shape index: {}]   ;;  %s3794_s4 = inlined_call_operand.hbm [shape: bf16[2,512,256], index: 4, kind: output, shape index: {0}]   ;;  %s3795_s5 = inlined_call_operand.vmem [shape: f32[2,12,256], index: 5, kind: output, shape index: {1}]  }
   0x1   :  { %3841 = sst [smem:[#allocation23_spill]] %s3790_s0 }
   0x2   :  { %3842 = sst [smem:[#allocation24_spill]] %s3791_s1 }
   0x3   :  { %3843 = sst [smem:[#allocation25_spill]] %s3792_s2 }
   0x4   :  { %11 = vsyncpa [#allocation3], 0 }
   0x5   :  { %13 = vsyncpa [#allocation3 + $0x1], 0  ;;  %s2707_s18 = smov 0   ;;  %s2709_s19 = smov 0  }
   0x6   :  { %s2711_s20 = smov 0   ;;  %s2713_s21 = smov 0  }
   0x7   :  { %s2715_s22 = smov 0   ;;  %s2717_s23 = smov 0  }
   0x8   :  { %s2719_s24 = smov 0   ;;  %s2721_s25 = smov 0  }
   0x9 LB: > { %s1848_s26 = sadd.s32 4294967295, %s2671_s25   ;;  %s1849_s27 = sadd.s32 4294967294, %s2671_s25   ;;  %s2671_s25 = sphi %s2721_s25, %s19_s25   ;;  %s2667_s24 = sphi %s2719_s24, %s3985_s24   ;;  %s2663_s23 = sphi %s2717_s23, %s3984_s23   ;;  %s2659_s22 = sphi %s2715_s22, %s3983_s22   ;;  %s2655_s21 = sphi %s2713_s21, %s3982_s21   ;;  %s2651_s20 = sphi %s2711_s20, %s3981_s20   ;;  %s2647_s19 = sphi %s2709_s19, %s3980_s19   ;;  %s2643_s18 = sphi %s2707_s18, %s3979_s18  }
   0xa   : > { %s28_s28 = sadd.s32 1, %s2663_s23  ;;  %s31_s29 = sadd.s32 1, %s2667_s24 }
   0xb   : > { %p29_p0 = scmp.ge.s32.totalorder %s28_s28, 2  ;;  %p158_p1 = scmp.ne.s32.totalorder %s2651_s20, %s2647_s19 }
   0xc   : > { %p159_p2 = scmp.eq.s32.totalorder %s1848_s26, 3  ;;  %p164_p5 = scmp.ne.s32.totalorder %s2647_s19, %s2643_s18 }
   0xd   : > { %s3987_s28 = smov (%p29_p0, %s28_s28), 0  ;;  %s3989_s29 = smov (!%p29_p0, %s31_s29), %s2667_s24 }
   0xe   : > { %s144_s30 = ssub.s32 %s2663_s23, %s3987_s28  ;;  %p2758_p3 = por %p159_p2, %p158_p1 }
   0xf   : > { %p33_p4 = scmp.ge.s32.totalorder %s3989_s29, 2  ;;  %p165_p6 = scmp.eq.s32.totalorder %s1849_s27, 3 }
  0x10   : > { %p1852_p7 = scmp.ge.s32.totalorder %s2671_s25, 1  ;;  %p249_p9 = scmp.lt.s32.totalorder %s2671_s25, 5 }
  0x11   : > { %s3991_s29 = smov (%p33_p4, %s3989_s29), 0  ;;  %p2767_p8 = por %p165_p6, %p164_p5 }
  0x12   : > { %s143_s8 = ssub.s32 %s2667_s24, %s3991_s29  ;;  %s148_s9 = sadd.s32 1, %s2651_s20 }
  0x13   : > { %s145_s10 = sor.u32 %s144_s30, %s143_s8  ;;  %p250_p10 = pnand %p1852_p7, %p249_p9 }
  0x14   : > { %p146_p11 = scmp.eq.s32.totalorder %s145_s10, 0 }
  0x15   : > { %253 = sbr.rel (%p250_p10) target bundleno = 897 (0x381), region = 36 }
  0x16   : > { %s2776_s11 = scalar_select %p146_p11, %s2651_s20, %s148_s9  }
  0x1c   : > { %p302_p12 = scmp.lt.s32.totalorder %s2659_s22, 1  ;;  %p309_p13 = scmp.lt.s32.totalorder %s2655_s21, 1  ;;  %vm421_vm0 = vcmask 1043456   ;;  %vm372_vm1 = vcmask 64512  }
  0x1d   : > { %s3846_s0 = sld [smem:[#allocation23_spill]]  ;;  %s3847_s1 = sld [smem:[#allocation24_spill]] }
  0x1e   : > { %s2781_s12 = scalar_select %p302_p12, %s2659_s22, 1 }
  0x1f   : > { %s310_s13 = scalar_select %p309_p13, %s2655_s21, 1 }
  0x20   : > { %s1967_s14 = sshll.u32 %s2781_s12, 5  ;;  %s1857_s15 = sshll.u32 %s2781_s12, 1 }
  0x21   : > { %s2791_s27 = sadd.s32 %s1857_s15, %s310_s13  ;;  %s3920_s2 = sld [smem:[#allocation25_spill]] }
  0x22   : > { %s1858_s30 = sshll.u32 %s2791_s27, 3  ;;  %s3542_s12 = sand.u32 1, %s2647_s19  }
  0x23   : > { %s306_s26 = scalar_lea.vmem %s3846_s0, %s1967_s14  ;;  %s314_s10 = scalar_lea.vmem %s3847_s1, %s1858_s30 }
  0x24   : > { %v332_v0 = vld [vmem:[%s306_s26] sm:$0xff]  ;;  %v333_v2 = vld [vmem:[%s306_s26 + $0x8] sm:$0xff]  ;;  %v334_v8 = vld [vmem:[%s306_s26 + $0x10] sm:$0xff]  ;;  %s1961_s15 = sshll.u32 %s2659_s22, 7  ;;  %s2673_s8 = smov [#allocation2]  }
  0x25   : > { %v336_v1 = vpack.c.bf16 %v332_v0, %v332_v0  ;;  %v337_v3 = vpack.c.bf16 %v333_v2, %v333_v2  ;;  %v329_v4 = vld [vmem:[%s314_s10] sm:$0xff]  ;;  %v335_v9 = vld [vmem:[%s306_s26 + $0x18] sm:$0xff]  ;;  %v338_v10 = vpack.c.bf16 %v334_v8, %v334_v8  ;;  %s1862_s26 = sshll.u32 %s2791_s27, 2  ;;  %s1854_s10 = sshll.u32 %s3542_s12, 4 }
  0x26   : > { %v330_v5 = vmul.f32 0.35355338, %v329_v4  ;;  %v339_v11 = vpack.c.bf16 %v335_v9, %v335_v9  ;;  %s327_s9 = scalar_lea.vmem %s3793_s3, %s1862_s26  ;;  %s3715_s13 = scalar_lea.vmem [#allocation4], %s1854_s10 }
  0x27   : > { %340 = vxpose.xlu0.c.b16.start.end [1/1] (short) %v336_v1, 128  ;;  %356 = vxpose.xlu1.c.b16.start.end [1/1] (short) %v337_v3, 128  ;;  %s3341_s16 = scalar_lea.vmem %s3920_s2, %s1967_s14  ;;  %s1853_s14 = sshll.u32 %s3542_s12, 8 }
  0x28   : > { %v331_v6 = vpack.c.bf16 %v330_v5, %v330_v5  ;;  %s3570_s17 = scalar_lea.vmem [#allocation2], %s1853_s14  ;;  %s1634_s26 = scalar_lea.sflag [#allocation3], %s3542_s12 }
  0x29   : > { %s1652_s14 = sshll.u32 %s3570_s17, 4  ;;  %s3721_s14 = int_to_ptr.vmem [resolvable:$true] %s1652_s14 }
  0x2a   : > { %2370 = vmatprep.subr.msk.bf16.mxu0 %vm421_vm0, %v331_v6  ;;  %v423_v7 = vsel %vm421_vm0, %v331_v6, 0  ;;  %2371 = vmatprep.subr.msk.bf16.mxu1 %vm421_vm0, %v331_v6  ;;  %s2577_s30 = scalar_lea.vmem %s3721_s14, 4096 }
  0x2b   : > { %2303 = vmatpush3.bf16.msra.mxu0 %v423_v7  ;;  %2337 = vmatpush3.bf16.msra.mxu1 %v423_v7  ;;  %p2578_p0 = scmp.ne.s32.totalorder %s3721_s14, %s2577_s30 }
  0x2d   : > { %p2579_p1 = pnand %p2578_p0, %p2758_p3 }
  0x2f   : > { %p2580_p2 = pneg %p2579_p1 }
  0x44   : > { %586 = vxpose.xlu0.c.b16.start.end [1/1] (short) %v338_v10, 128  ;;  %602 = vxpose.xlu1.c.b16.start.end [1/1] (short) %v339_v11, 128 }
  0x8d   : > { %v348_v12 = vpop.trf.xlu0  ;;  %v364_v13 = vpop.trf.xlu1 }
  0x8e   : > { %2304 = vmatprep.mubr.msk.bf16.mxu0 %vm372_vm1, %v348_v12 }
  0x91   : > { %v349_v14 = vpop.trf.xlu0  ;;  %v365_v15 = vpop.trf.xlu1 }
  0x92   : > { %2305 = vmatmul.mubr.msk.bf16.vlgmr.msra.gmra.mrb[0].mxu0 %vm372_vm1, %v349_v14 }
  0x95   : > { %v350_v16 = vpop.trf.xlu0  ;;  %v366_v17 = vpop.trf.xlu1 }
  0x96   : > { %2308 = vmatprep.mubr.msk.bf16.mxu0 %vm372_vm1, %v350_v16 }
  0x99   : > { %v351_v18 = vpop.trf.xlu0  ;;  %v367_v20 = vpop.trf.xlu1 }
  0x9a   : > { %2309 = vmatmul.mubr.msk.bf16.gmra.mrb[4].mxu0 %vm372_vm1, %v351_v18 }
  0x9d   : > { %v352_v19 = vpop.trf.xlu0  ;;  %v368_v22 = vpop.trf.xlu1 }
  0x9e   : > { %2312 = vmatprep.mubr.msk.bf16.mxu0 %vm372_vm1, %v352_v19 }
  0xa1   : > { %v353_v21 = vpop.trf.xlu0  ;;  %v369_v25 = vpop.trf.xlu1 }
  0xa2   : > { %2313 = vmatmul.mubr.msk.bf16.gmra.mrb[8].mxu0 %vm372_vm1, %v353_v21 }
  0xa5   : > { %v354_v23 = vpop.trf.xlu0  ;;  %v370_v27 = vpop.trf.xlu1 }
  0xa6   : > { %2316 = vmatprep.mubr.msk.bf16.mxu0 %vm372_vm1, %v354_v23 }
  0xa9   : > { %v355_v24 = vpop.trf.xlu0  ;;  %v371_v30 = vpop.trf.xlu1 }
  0xaa   : > { %2317 = vmatmul.mubr.msk.bf16.gmra.mrb[12].mxu0 %vm372_vm1, %v355_v24 }
  0xab   : > { %2320 = vmatprep.mubr.msk.bf16.mxu0 %vm372_vm1, %v364_v13 }
  0xad   : > { %v594_v26 = vpop.trf.xlu0  ;;  %v610_v32 = vpop.trf.xlu1 }
  0xae   : > { %2338 = vmatprep.mubr.msk.bf16.mxu1 %vm372_vm1, %v594_v26 }
  0xb1   : > { %v595_v28 = vpop.trf.xlu0  ;;  %v611_v35 = vpop.trf.xlu1 }
  0xb2   : > { %2321 = vmatmul.mubr.msk.bf16.gmra.mrb[16].mxu0 %vm372_vm1, %v365_v15  ;;  %2339 = vmatmul.mubr.msk.bf16.vlgmr.msra.gmra.mrb[0].mxu1 %vm372_vm1, %v595_v28 }
  0xb3   : > { %2324 = vmatprep.mubr.msk.bf16.mxu0 %vm372_vm1, %v366_v17 }
  0xb5   : > { %v596_v29 = vpop.trf.xlu0  ;;  %v612_v37 = vpop.trf.xlu1 }
  0xb6   : > { %2342 = vmatprep.mubr.msk.bf16.mxu1 %vm372_vm1, %v596_v29 }
  0xb9   : > { %v597_v31 = vpop.trf.xlu0  ;;  %v613_v39 = vpop.trf.xlu1 }
  0xba   : > { %2325 = vmatmul.mubr.msk.bf16.gmra.mrb[20].mxu0 %vm372_vm1, %v367_v20  ;;  %2343 = vmatmul.mubr.msk.bf16.gmra.mrb[4].mxu1 %vm372_vm1, %v597_v31 }
  0xbb   : > { %2328 = vmatprep.mubr.msk.bf16.mxu0 %vm372_vm1, %v368_v22 }
  0xbd   : > { %v598_v33 = vpop.trf.xlu0  ;;  %v614_v40 = vpop.trf.xlu1 }
  0xbe   : > { %2346 = vmatprep.mubr.msk.bf16.mxu1 %vm372_vm1, %v598_v33 }
  0xc1   : > { %v599_v34 = vpop.trf.xlu0  ;;  %v615_v41 = vpop.trf.xlu1 }
  0xc2   : > { %2329 = vmatmul.mubr.msk.bf16.gmra.mrb[24].mxu0 %vm372_vm1, %v369_v25  ;;  %2347 = vmatmul.mubr.msk.bf16.gmra.mrb[8].mxu1 %vm372_vm1, %v599_v34 }
  0xc3   : > { %2332 = vmatprep.mubr.msk.bf16.mxu0 %vm372_vm1, %v370_v27 }
  0xc5   : > { %v600_v36 = vpop.trf.xlu0  ;;  %v616_v42 = vpop.trf.xlu1 }
  0xc6   : > { %2350 = vmatprep.mubr.msk.bf16.mxu1 %vm372_vm1, %v600_v36 }
  0xc9   : > { %v601_v38 = vpop.trf.xlu0  ;;  %v617_v43 = vpop.trf.xlu1 }
  0xca   : > { %2333 = vmatmul.mubr.msk.bf16.gmra.mrb[28].mxu0 %vm372_vm1, %v371_v30  ;;  %2351 = vmatmul.mubr.msk.bf16.gmra.mrb[12].mxu1 %vm372_vm1, %v601_v38 }
  0xcb   : > { %2354 = vmatprep.mubr.msk.bf16.mxu1 %vm372_vm1, %v610_v32 }
  0xd2   : > { %2355 = vmatmul.mubr.msk.bf16.gmra.mrb[16].mxu1 %vm372_vm1, %v611_v35 }
  0xd3   : > { %2358 = vmatprep.mubr.msk.bf16.mxu1 %vm372_vm1, %v612_v37 }
  0xda   : > { %2359 = vmatmul.mubr.msk.bf16.gmra.mrb[20].mxu1 %vm372_vm1, %v613_v39 }
  0xdb   : > { %2362 = vmatprep.mubr.msk.bf16.mxu1 %vm372_vm1, %v614_v40 }
  0xe2   : > { %2363 = vmatmul.mubr.msk.bf16.gmra.mrb[24].mxu1 %vm372_vm1, %v615_v41 }
  0xe3   : > { %2366 = vmatprep.mubr.msk.bf16.mxu1 %vm372_vm1, %v616_v42 }
  0xea   : > { %2367 = vmatmul.mubr.msk.bf16.gmra.mrb[28].mxu1 %vm372_vm1, %v617_v43 }
 0x165   : > { %v2829_v44 = vpop.f32.mrb[0].mxu0 }
 0x166   : > { %v2831_v45 = vpop.f32.mrb[1].mxu0 }
 0x167   : > { %v2833_v46 = vpop.f32.mrb[2].mxu0 }
 0x168   : > { %v2835_v47 = vpop.f32.mrb[3].mxu0 }
 0x16d   : > { %v2837_v48 = vpop.f32.mrb[4].mxu0 }
 0x16e   : > { %v829_v49 = vmax.f32 %v2829_v44, %v2837_v48  ;;  %v2841_v50 = vpop.f32.mrb[5].mxu0 }
 0x16f   : > { %v827_v51 = vmax.f32 %v2831_v45, %v2841_v50  ;;  %v2845_v52 = vpop.f32.mrb[6].mxu0 }
 0x170   : > { %v830_v53 = vmax.f32 %v2833_v46, %v2845_v52  ;;  %v2849_v54 = vpop.f32.mrb[7].mxu0 }
 0x171   : > { %v828_v55 = vmax.f32 %v2835_v47, %v2849_v54 }
 0x175   : > { %v2853_v56 = vpop.f32.mrb[8].mxu0 }
 0x176   : > { %v833_v57 = vmax.f32 %v829_v49, %v2853_v56  ;;  %v2856_v58 = vpop.f32.mrb[9].mxu0 }
 0x177   : > { %v831_v59 = vmax.f32 %v827_v51, %v2856_v58  ;;  %v2859_v60 = vpop.f32.mrb[10].mxu0 }
 0x178   : > { %v834_v61 = vmax.f32 %v830_v53, %v2859_v60  ;;  %v2862_v62 = vpop.f32.mrb[11].mxu0 }
 0x179   : > { %v832_v63 = vmax.f32 %v828_v55, %v2862_v62 }
 0x17d   : > { %v2865_v0 = vpop.f32.mrb[12].mxu0 }
 0x17e   : > { %v837_v1 = vmax.f32 %v833_v57, %v2865_v0  ;;  %v2868_v2 = vpop.f32.mrb[13].mxu0 }
 0x17f   : > { %v835_v3 = vmax.f32 %v831_v59, %v2868_v2  ;;  %v2871_v4 = vpop.f32.mrb[14].mxu0 }
 0x180   : > { %v838_v5 = vmax.f32 %v834_v61, %v2871_v4  ;;  %v2874_v6 = vpop.f32.mrb[15].mxu0 }
 0x181   : > { %v836_v7 = vmax.f32 %v832_v63, %v2874_v6 }
 0x185   : > { %v2877_v8 = vpop.f32.mrb[16].mxu0  ;;  %v2879_v9 = vpop.f32.mrb[0].mxu1 }
 0x186   : > { %v841_v10 = vmax.f32 %v837_v1, %v2877_v8  ;;  %v2882_v11 = vpop.f32.mrb[17].mxu0  ;;  %v2884_v12 = vpop.f32.mrb[1].mxu1 }
 0x187   : > { %v839_v13 = vmax.f32 %v835_v3, %v2882_v11  ;;  %v2887_v14 = vpop.f32.mrb[18].mxu0  ;;  %v2889_v15 = vpop.f32.mrb[2].mxu1 }
 0x188   : > { %v842_v16 = vmax.f32 %v838_v5, %v2887_v14  ;;  %v2892_v17 = vpop.f32.mrb[19].mxu0  ;;  %v2894_v18 = vpop.f32.mrb[3].mxu1 }
 0x189   : > { %v840_v19 = vmax.f32 %v836_v7, %v2892_v17 }
 0x18d   : > { %v2897_v20 = vpop.f32.mrb[20].mxu0  ;;  %v2899_v21 = vpop.f32.mrb[4].mxu1 }
 0x18e   : > { %v845_v22 = vmax.f32 %v841_v10, %v2897_v20  ;;  %v2902_v23 = vpop.f32.mrb[21].mxu0  ;;  %v2904_v24 = vpop.f32.mrb[5].mxu1 }
 0x18f   : > { %v843_v25 = vmax.f32 %v839_v13, %v2902_v23  ;;  %v2907_v26 = vpop.f32.mrb[22].mxu0  ;;  %v2909_v27 = vpop.f32.mrb[6].mxu1 }
 0x190   : > { %v846_v28 = vmax.f32 %v842_v16, %v2907_v26  ;;  %v2912_v29 = vpop.f32.mrb[23].mxu0  ;;  %v2914_v30 = vpop.f32.mrb[7].mxu1 }
 0x191   : > { %v844_v31 = vmax.f32 %v840_v19, %v2912_v29 }
 0x195   : > { %v2917_v32 = vpop.f32.mrb[24].mxu0  ;;  %v2919_v33 = vpop.f32.mrb[8].mxu1 }
 0x196   : > { %v849_v34 = vmax.f32 %v845_v22, %v2917_v32  ;;  %v2922_v35 = vpop.f32.mrb[25].mxu0  ;;  %v2924_v36 = vpop.f32.mrb[9].mxu1 }
 0x197   : > { %v847_v37 = vmax.f32 %v843_v25, %v2922_v35  ;;  %v2927_v38 = vpop.f32.mrb[26].mxu0  ;;  %v2929_v39 = vpop.f32.mrb[10].mxu1 }
 0x198   : > { %v850_v40 = vmax.f32 %v846_v28, %v2927_v38  ;;  %v2932_v41 = vpop.f32.mrb[27].mxu0  ;;  %v2934_v42 = vpop.f32.mrb[11].mxu1 }
 0x199   : > { %v848_v43 = vmax.f32 %v844_v31, %v2932_v41 }
 0x19d   : > { %v2937_v49 = vpop.f32.mrb[28].mxu0  ;;  %v2939_v51 = vpop.f32.mrb[12].mxu1 }
 0x19e   : > { %3848 = vst [vmem:[#allocation6_spill] sm:$0xff] %v2939_v51  ;;  %v853_v53 = vmax.f32 %v849_v34, %v2937_v49  ;;  %v2942_v55 = vpop.f32.mrb[29].mxu0  ;;  %v2944_v57 = vpop.f32.mrb[13].mxu1 }
 0x19f   : > { %v851_v59 = vmax.f32 %v847_v37, %v2942_v55  ;;  %v2947_v61 = vpop.f32.mrb[30].mxu0  ;;  %v2949_v63 = vpop.f32.mrb[14].mxu1 }
 0x1a0   : > { %3849 = vst [vmem:[#allocation7_spill] sm:$0xff] %v2949_v63  ;;  %v857_v1 = vmax.f32 %v853_v53, %v2879_v9  ;;  %v854_v3 = vmax.f32 %v850_v40, %v2947_v61  ;;  %v2953_v5 = vpop.f32.mrb[31].mxu0  ;;  %v2955_v7 = vpop.f32.mrb[15].mxu1 }
 0x1a1   : > { %3850 = vst [vmem:[#allocation8_spill] sm:$0xff] %v2955_v7  ;;  %v855_v10 = vmax.f32 %v851_v59, %v2884_v12  ;;  %v852_v13 = vmax.f32 %v848_v43, %v2953_v5 }
 0x1a2   : > { %v861_v16 = vmax.f32 %v857_v1, %v2899_v21  ;;  %v858_v19 = vmax.f32 %v854_v3, %v2889_v15 }
 0x1a3   : > { %v859_v22 = vmax.f32 %v855_v10, %v2904_v24  ;;  %v856_v25 = vmax.f32 %v852_v13, %v2894_v18 }
 0x1a4   : > { %v865_v28 = vmax.f32 %v861_v16, %v2919_v33  ;;  %v862_v31 = vmax.f32 %v858_v19, %v2909_v27 }
 0x1a5   : > { %v863_v34 = vmax.f32 %v859_v22, %v2924_v36  ;;  %v860_v37 = vmax.f32 %v856_v25, %v2914_v30  ;;  %v2967_v40 = vpop.f32.mrb[16].mxu1 }
 0x1a6   : > { %3851 = vst [vmem:[#allocation9_spill] sm:$0xff] %v2967_v40  ;;  %v869_v43 = vmax.f32 %v865_v28, %v2939_v51  ;;  %v866_v53 = vmax.f32 %v862_v31, %v2929_v39  ;;  %v2971_v59 = vpop.f32.mrb[17].mxu1 }
 0x1a7   : > { %3852 = vst [vmem:[#allocation10_spill] sm:$0xff] %v2971_v59  ;;  %v867_v1 = vmax.f32 %v863_v34, %v2944_v57  ;;  %v864_v3 = vmax.f32 %v860_v37, %v2934_v42  ;;  %v2975_v10 = vpop.f32.mrb[18].mxu1 }
 0x1a8   : > { %3853 = vst [vmem:[#allocation11_spill] sm:$0xff] %v2975_v10  ;;  %v870_v13 = vmax.f32 %v866_v53, %v2949_v63  ;;  %v873_v16 = vmax.f32 %v869_v43, %v2967_v40  ;;  %v2979_v19 = vpop.f32.mrb[19].mxu1 }
 0x1a9   : > { %3854 = vst [vmem:[#allocation12_spill] sm:$0xff] %v2979_v19  ;;  %v868_v22 = vmax.f32 %v864_v3, %v2955_v7  ;;  %v871_v25 = vmax.f32 %v867_v1, %v2971_v59 }
 0x1aa   : > { %v874_v28 = vmax.f32 %v870_v13, %v2975_v10 }
 0x1ab   : > { %v872_v31 = vmax.f32 %v868_v22, %v2979_v19 }
 0x1ad   : > { %v2985_v51 = vpop.f32.mrb[20].mxu1 }
 0x1ae   : > { %3855 = vst [vmem:[#allocation13_spill] sm:$0xff] %v2985_v51  ;;  %v877_v34 = vmax.f32 %v873_v16, %v2985_v51  ;;  %v2988_v37 = vpop.f32.mrb[21].mxu1 }
 0x1af   : > { %3856 = vst [vmem:[#allocation14_spill] sm:$0xff] %v2988_v37  ;;  %v875_v53 = vmax.f32 %v871_v25, %v2988_v37  ;;  %v2991_v63 = vpop.f32.mrb[22].mxu1 }
 0x1b0   : > { %3857 = vst [vmem:[#allocation15_spill] sm:$0xff] %v2991_v63  ;;  %v878_v43 = vmax.f32 %v874_v28, %v2991_v63  ;;  %v2994_v40 = vpop.f32.mrb[23].mxu1 }
 0x1b1   : > { %3858 = vst [vmem:[#allocation16_spill] sm:$0xff] %v2994_v40  ;;  %v876_v1 = vmax.f32 %v872_v31, %v2994_v40 }
 0x1b5   : > { %v2997_v3 = vpop.f32.mrb[24].mxu1 }
 0x1b6   : > { %3859 = vst [vmem:[#allocation17_spill] sm:$0xff] %v2997_v3  ;;  %v881_v13 = vmax.f32 %v877_v34, %v2997_v3  ;;  %v3000_v22 = vpop.f32.mrb[25].mxu1 }
 0x1b7   : > { %3860 = vst [vmem:[#allocation18_spill] sm:$0xff] %v3000_v22  ;;  %v879_v16 = vmax.f32 %v875_v53, %v3000_v22  ;;  %v3003_v51 = vpop.f32.mrb[26].mxu1 }
 0x1b8   : > { %3861 = vst [vmem:[#allocation19_spill] sm:$0xff] %v3003_v51  ;;  %v882_v25 = vmax.f32 %v878_v43, %v3003_v51  ;;  %v3006_v37 = vpop.f32.mrb[27].mxu1 }
 0x1b9   : > { %3862 = vst [vmem:[#allocation20_spill] sm:$0xff] %v3006_v37  ;;  %v880_v28 = vmax.f32 %v876_v1, %v3006_v37 }
 0x1bd   : > { %v3009_v63 = vpop.f32.mrb[28].mxu1 }
 0x1be   : > { %3863 = vst [vmem:[#allocation21_spill] sm:$0xff] %v3009_v63  ;;  %v885_v31 = vmax.f32 %v881_v13, %v3009_v63  ;;  %v3012_v40 = vpop.f32.mrb[29].mxu1 }
 0x1bf   : > { %v883_v34 = vmax.f32 %v879_v16, %v3012_v40  ;;  %v3015_v3 = vpop.f32.mrb[30].mxu1 }
 0x1c0   : > { %3864 = vst [vmem:[#allocation22_spill] sm:$0xff] %v3015_v3  ;;  %v886_v53 = vmax.f32 %v882_v25, %v3015_v3  ;;  %v3018_v22 = vpop.f32.mrb[31].mxu1  ;;  %v3878_v3 = vld [vmem:[#allocation17_spill] sm:$0xff]  ;;  %v3879_v25 = vld [vmem:[#allocation19_spill] sm:$0xff] }
 0x1c1   : > { %v884_v43 = vmax.f32 %v880_v28, %v3018_v22 }
 0x1c2   : > { %v888_v51 = vmax.f32 %v885_v31, %v886_v53  ;;  %v3865_v31 = vld [vmem:[#allocation8_spill] sm:$0xff] }
 0x1c3   : > { %v887_v10 = vmax.f32 %v883_v34, %v884_v43  ;;  %v3866_v34 = vld [vmem:[#allocation6_spill] sm:$0xff] }
 0x1c5   : > { %v889_v19 = vmax.f32 %v887_v10, %v888_v51  ;;  %v3873_v10 = vld [vmem:[#allocation16_spill] sm:$0xff] }
 0x1c7   : > { %v890_v1 = vrot.slane %v889_v19, 4 }
 0x1c9   : > { %v891_v37 = vmax.f32 %v889_v19, %v890_v1  ;;  %v3881_v1 = vld [vmem:[#allocation22_spill] sm:$0xff] }
 0x1cb   : > { %v892_v59 = vrot.slane %v891_v37, 2 }
 0x1cd   : > { %v893_v7 = vmax.f32 %v891_v37, %v892_v59 }
 0x1cf   : > { %v894_v13 = vrot.slane %v893_v7, 1 }
 0x1d1   : > { %v3021_v63 = vmax.f32 %v893_v7, %v894_v13  ;;  %v3874_v7 = vld [vmem:[#allocation13_spill] sm:$0xff] }
 0x1d3   : > { %v3882_v13 = vsub.f32 %v2831_v45, %v3021_v63  ;;  %v3883_v37 = vsub.f32 %v2835_v47, %v3021_v63  ;;  %v3884_v16 = vsub.f32 %v2829_v44, %v3021_v63  ;;  %v3885_v59 = vsub.f32 %v2833_v46, %v3021_v63 }
 0x1d4   : > { %v3886_v51 = vsub.f32 %v2841_v50, %v3021_v63  ;;  %v3887_v47 = vsub.f32 %v2849_v54, %v3021_v63  ;;  %v3889_v46 = vsub.f32 %v2845_v52, %v3021_v63  ;;  %v3892_v52 = vsub.f32 %v2853_v56, %v3021_v63 }
 0x1d5   : > { %v960_v28 = vmul.f32 1.442695, %v3882_v13  ;;  %v962_v19 = vmul.f32 1.442695, %v3883_v37  ;;  %v964_v53 = vmul.f32 1.442695, %v3884_v16 }
 0x1d6   : > { %v966_v43 = vmul.f32 1.442695, %v3885_v59  ;;  %v968_v45 = vmul.f32 1.442695, %v3886_v51  ;;  %v970_v37 = vmul.f32 1.442695, %v3887_v47  ;;  %v3890_v51 = vsub.f32 %v2856_v58, %v3021_v63 }
 0x1d7   : > { %2447 = vpow2.f32 %v960_v28  ;;  %v3888_v28 = vsub.f32 %v2837_v48, %v3021_v63  ;;  %v974_v50 = vmul.f32 1.442695, %v3889_v46  ;;  %v3891_v48 = vsub.f32 %v2862_v62, %v3021_v63 }
 0x1d8   : > { %2449 = vpow2.f32 %v962_v19  ;;  %v976_v54 = vmul.f32 1.442695, %v3890_v51  ;;  %v980_v58 = vmul.f32 1.442695, %v3892_v52 }
 0x1d9   : > { %2451 = vpow2.f32 %v964_v53  ;;  %v972_v44 = vmul.f32 1.442695, %v3888_v28  ;;  %v3893_v28 = vsub.f32 %v2859_v60, %v3021_v63 }
 0x1da   : > { %2453 = vpow2.f32 %v966_v43  ;;  %v978_v43 = vmul.f32 1.442695, %v3891_v48 }
 0x1db   : > { %2455 = vpow2.f32 %v968_v45 }
 0x1dc   : > { %2457 = vpow2.f32 %v970_v37 }
 0x1dd   : > { %2459 = vpow2.f32 %v972_v44  ;;  %v982_v44 = vmul.f32 1.442695, %v3893_v28 }
 0x1de   : > { %2461 = vpow2.f32 %v974_v50  ;;  %v3894_v50 = vsub.f32 %v2868_v2, %v3021_v63 }
 0x1df   : > { %2463 = vpow2.f32 %v976_v54 }
 0x1e0   : > { %2465 = vpow2.f32 %v978_v43  ;;  %v984_v51 = vmul.f32 1.442695, %v3894_v50 }
 0x1e1   : > { %v3172_v16 = vpop.eup %2447  ;;  %2467 = vpow2.f32 %v980_v58 }
 0x1e2   : > { %v3174_v19 = vpop.eup %2449  ;;  %2469 = vpow2.f32 %v982_v44 }
 0x1e3   : > { %v1088_v59 = vadd.f32 %v3174_v19, %v3172_v16  ;;  %v3184_v53 = vpop.eup %2451  ;;  %2471 = vpow2.f32 %v984_v51 }
 0x1e4   : > { %v3190_v45 = vpop.eup %2453 }
 0x1e5   : > { %v1089_v13 = vadd.f32 %v3184_v53, %v1088_v59  ;;  %v3196_v37 = vpop.eup %2455  ;;  %v3895_v59 = vsub.f32 %v2874_v6, %v3021_v63 }
 0x1e6   : > { %v3202_v46 = vpop.eup %2457 }
 0x1e7   : > { %v1090_v47 = vadd.f32 %v3190_v45, %v1089_v13  ;;  %v3208_v54 = vpop.eup %2459  ;;  %v986_v48 = vmul.f32 1.442695, %v3895_v59  ;;  %v3896_v13 = vsub.f32 %v2865_v0, %v3021_v63 }
 0x1e8   : > { %v3214_v43 = vpop.eup %2461 }
 0x1e9   : > { %v1091_v62 = vadd.f32 %v3196_v37, %v1090_v47  ;;  %v988_v52 = vmul.f32 1.442695, %v3896_v13  ;;  %v3220_v58 = vpop.eup %2463  ;;  %2473 = vpow2.f32 %v986_v48  ;;  %v3897_v47 = vsub.f32 %v2871_v4, %v3021_v63 }
 0x1ea   : > { %v3226_v44 = vpop.eup %2465 }
 0x1eb   : > { %v1092_v56 = vadd.f32 %v3202_v46, %v1091_v62  ;;  %v990_v28 = vmul.f32 1.442695, %v3897_v47  ;;  %2475 = vpow2.f32 %v988_v52  ;;  %v3898_v62 = vsub.f32 %v2882_v11, %v3021_v63  ;;  %v3232_v51 = vpop.eup %2467 }
 0x1ec   : > { %v3238_v48 = vpop.eup %2469 }
 0x1ed   : > { %v1093_v60 = vadd.f32 %v3208_v54, %v1092_v56  ;;  %v992_v50 = vmul.f32 1.442695, %v3898_v62  ;;  %2477 = vpow2.f32 %v990_v28  ;;  %v3899_v56 = vsub.f32 %v2892_v17, %v3021_v63  ;;  %v3244_v52 = vpop.eup %2471 }
 0x1ee   : > { %3901 = vst [vmem:[#allocation8_spill] sm:$0xff] %v3244_v52 }
 0x1ef   : > { %v1094_v2 = vadd.f32 %v3214_v43, %v1093_v60  ;;  %v994_v59 = vmul.f32 1.442695, %v3899_v56  ;;  %2479 = vpow2.f32 %v992_v50  ;;  %v3900_v60 = vsub.f32 %v2877_v8, %v3021_v63 }
 0x1f1   : > { %v1095_v6 = vadd.f32 %v3220_v58, %v1094_v2  ;;  %v996_v13 = vmul.f32 1.442695, %v3900_v60  ;;  %2481 = vpow2.f32 %v994_v59  ;;  %v3902_v2 = vsub.f32 %v2887_v14, %v3021_v63 }
 0x1f3   : > { %v1096_v0 = vadd.f32 %v3226_v44, %v1095_v6  ;;  %v998_v47 = vmul.f32 1.442695, %v3902_v2  ;;  %v3250_v28 = vpop.eup %2473  ;;  %2483 = vpow2.f32 %v996_v13  ;;  %v3904_v6 = vsub.f32 %v2902_v23, %v3021_v63 }
 0x1f4   : > { %3903 = vst [vmem:[#allocation6_spill] sm:$0xff] %v3250_v28 }
 0x1f5   : > { %v1097_v4 = vadd.f32 %v3232_v51, %v1096_v0  ;;  %v1000_v62 = vmul.f32 1.442695, %v3904_v6  ;;  %v3256_v50 = vpop.eup %2475  ;;  %2485 = vpow2.f32 %v998_v47  ;;  %v3906_v0 = vsub.f32 %v2912_v29, %v3021_v63 }
 0x1f6   : > { %3905 = vst [vmem:[#allocation16_spill] sm:$0xff] %v3256_v50 }
 0x1f7   : > { %v1098_v11 = vadd.f32 %v3238_v48, %v1097_v4  ;;  %v1002_v56 = vmul.f32 1.442695, %v3906_v0  ;;  %v3262_v59 = vpop.eup %2477  ;;  %2487 = vpow2.f32 %v1000_v62  ;;  %v3908_v4 = vsub.f32 %v2897_v20, %v3021_v63 }
 0x1f8   : > { %3907 = vst [vmem:[#allocation13_spill] sm:$0xff] %v3262_v59 }
 0x1f9   : > { %v1099_v17 = vadd.f32 %v3244_v52, %v1098_v11  ;;  %v1004_v60 = vmul.f32 1.442695, %v3908_v4  ;;  %v3268_v13 = vpop.eup %2479  ;;  %2489 = vpow2.f32 %v1002_v56  ;;  %v3909_v11 = vsub.f32 %v2907_v26, %v3021_v63 }
 0x1fb   : > { %v1100_v8 = vadd.f32 %v3250_v28, %v1099_v17  ;;  %v1006_v2 = vmul.f32 1.442695, %v3909_v11  ;;  %v3274_v47 = vpop.eup %2481  ;;  %2491 = vpow2.f32 %v1004_v60  ;;  %v3910_v17 = vsub.f32 %v2922_v35, %v3021_v63 }
 0x1fd   : > { %v1101_v14 = vadd.f32 %v3256_v50, %v1100_v8  ;;  %v1008_v6 = vmul.f32 1.442695, %v3910_v17  ;;  %v3280_v62 = vpop.eup %2483  ;;  %2493 = vpow2.f32 %v1006_v2  ;;  %v3911_v8 = vsub.f32 %v2932_v41, %v3021_v63 }
 0x1ff   : > { %v1102_v23 = vadd.f32 %v3262_v59, %v1101_v14  ;;  %v1010_v0 = vmul.f32 1.442695, %v3911_v8  ;;  %v3286_v56 = vpop.eup %2485  ;;  %2495 = vpow2.f32 %v1008_v6  ;;  %v3912_v14 = vsub.f32 %v2917_v32, %v3021_v63 }
 0x201   : > { %v1103_v29 = vadd.f32 %v3268_v13, %v1102_v23  ;;  %v1012_v4 = vmul.f32 1.442695, %v3912_v14  ;;  %v3292_v60 = vpop.eup %2487  ;;  %2497 = vpow2.f32 %v1010_v0  ;;  %v3913_v23 = vsub.f32 %v2927_v38, %v3021_v63 }
 0x203   : > { %v1104_v20 = vadd.f32 %v3274_v47, %v1103_v29  ;;  %v1014_v11 = vmul.f32 1.442695, %v3913_v23  ;;  %v3298_v2 = vpop.eup %2489  ;;  %2499 = vpow2.f32 %v1012_v4  ;;  %v3914_v29 = vsub.f32 %v2942_v55, %v3021_v63 }
 0x205   : > { %v1105_v26 = vadd.f32 %v3280_v62, %v1104_v20  ;;  %v1016_v17 = vmul.f32 1.442695, %v3914_v29  ;;  %v3304_v6 = vpop.eup %2491  ;;  %2501 = vpow2.f32 %v1014_v11  ;;  %v3915_v20 = vsub.f32 %v2953_v5, %v3021_v63 }
 0x207   : > { %v1106_v35 = vadd.f32 %v3286_v56, %v1105_v26  ;;  %v1018_v8 = vmul.f32 1.442695, %v3915_v20  ;;  %v3310_v0 = vpop.eup %2493  ;;  %2503 = vpow2.f32 %v1016_v17  ;;  %v3916_v26 = vsub.f32 %v2937_v49, %v3021_v63 }
 0x209   : > { %v1107_v41 = vadd.f32 %v3292_v60, %v1106_v35  ;;  %v1020_v55 = vmul.f32 1.442695, %v3916_v26  ;;  %v3316_v4 = vpop.eup %2495  ;;  %2505 = vpow2.f32 %v1018_v8  ;;  %v3917_v35 = vsub.f32 %v2947_v61, %v3021_v63 }
 0x20b   : > { %v1108_v32 = vadd.f32 %v3298_v2, %v1107_v41  ;;  %v1022_v5 = vmul.f32 1.442695, %v3917_v35  ;;  %v3322_v11 = vpop.eup %2497  ;;  %2507 = vpow2.f32 %v1020_v55  ;;  %v3918_v41 = vsub.f32 %v2884_v12, %v3021_v63 }
 0x20c   : > { %v3921_v12 = vsub.f32 %v2879_v9, %v3021_v63  ;;  %v3922_v55 = vsub.f32 %v2889_v15, %v3021_v63  ;;  %v3924_v9 = vsub.f32 %v2904_v24, %v3021_v63  ;;  %v3926_v15 = vsub.f32 %v2914_v30, %v3021_v63 }
 0x20d   : > { %v1109_v38 = vadd.f32 %v3304_v6, %v1108_v32  ;;  %v1024_v49 = vmul.f32 1.442695, %v3918_v41  ;;  %v3328_v17 = vpop.eup %2499  ;;  %2509 = vpow2.f32 %v1022_v5  ;;  %v3919_v32 = vsub.f32 %v2894_v18, %v3021_v63  ;;  %v1543_v5 = vld [vmem:[%s3341_s16 + $0x8] sm:$0xff] }
 0x20e   : > { %v3928_v24 = vsub.f32 %v2899_v21, %v3021_v63  ;;  %v3929_v30 = vsub.f32 %v2909_v27, %v3021_v63 }
 0x20f   : > { %v1110_v14 = vadd.f32 %v3310_v0, %v1109_v38  ;;  %v1026_v20 = vmul.f32 1.442695, %v3919_v32  ;;  %v3334_v8 = vpop.eup %2501  ;;  %2511 = vpow2.f32 %v1024_v49  ;;  %v1028_v38 = vmul.f32 1.442695, %v3921_v12 }
 0x210   : > { %v1032_v49 = vmul.f32 1.442695, %v3924_v9  ;;  %v1034_v12 = vmul.f32 1.442695, %v3926_v15 }
 0x211   : > { %v1111_v23 = vadd.f32 %v3316_v4, %v1110_v14  ;;  %v3347_v26 = vpop.eup %2503  ;;  %2513 = vpow2.f32 %v1026_v20  ;;  %v1030_v14 = vmul.f32 1.442695, %v3922_v55  ;;  %v1036_v55 = vmul.f32 1.442695, %v3928_v24 }
 0x212   : > { %2515 = vpow2.f32 %v1028_v38 }
 0x213   : > { %v1112_v29 = vadd.f32 %v3322_v11, %v1111_v23  ;;  %v1545_v23 = vld [vmem:[%s3341_s16 + $0x18] sm:$0xff]  ;;  %v3355_v41 = vpop.eup %2505  ;;  %2517 = vpow2.f32 %v1030_v14  ;;  %v1038_v14 = vmul.f32 1.442695, %v3929_v30 }
 0x214   : > { %3923 = vst [vmem:[#allocation17_spill] sm:$0xff] %v3355_v41  ;;  %v1549_v32 = vpack.c.bf16 %v1545_v23, %v1545_v23  ;;  %2519 = vpow2.f32 %v1032_v49  ;;  %v3930_v49 = vsub.f32 %v2924_v36, %v3021_v63 }
 0x215   : > { %v1113_v61 = vadd.f32 %v3328_v17, %v1112_v29  ;;  %v1547_v29 = vpack.c.bf16 %v1543_v5, %v1543_v5  ;;  %v3361_v20 = vpop.eup %2507  ;;  %2521 = vpow2.f32 %v1034_v12 }
 0x216   : > { %3925 = vst [vmem:[#allocation19_spill] sm:$0xff] %v3361_v20  ;;  %1622 = vmatprep.mubr.bf16.mxu1 %v1549_v32  ;;  %2523 = vpow2.f32 %v1036_v55 }
 0x217   : > { %v1114_v18 = vadd.f32 %v3334_v8, %v1113_v61  ;;  %1582 = vmatprep.mubr.bf16.mxu0 %v1547_v29  ;;  %v3367_v38 = vpop.eup %2509  ;;  %v1040_v29 = vmul.f32 1.442695, %v3930_v49  ;;  %2525 = vpow2.f32 %v1038_v14 }
 0x218   : > { %3927 = vst [vmem:[#allocation22_spill] sm:$0xff] %v3367_v38 }
 0x219   : > { %v1115_v35 = vadd.f32 %v3347_v26, %v1114_v18  ;;  %v3373_v5 = vpop.eup %2511  ;;  %2527 = vpow2.f32 %v1040_v29 }
 0x21b   : > { %v1116_v61 = vadd.f32 %v3355_v41, %v1115_v35  ;;  %v3379_v9 = vpop.eup %2513 }
 0x21c   : > { %v3385_v32 = vpop.eup %2515 }
 0x21d   : > { %v1117_v18 = vadd.f32 %v3361_v20, %v1116_v61  ;;  %v3931_v61 = vsub.f32 %v2934_v42, %v3021_v63  ;;  %v3391_v12 = vpop.eup %2517 }
 0x21e   : > { %v3397_v55 = vpop.eup %2519 }
 0x21f   : > { %v1118_v35 = vadd.f32 %v3367_v38, %v1117_v18  ;;  %v1042_v15 = vmul.f32 1.442695, %v3931_v61  ;;  %v3932_v18 = vsub.f32 %v2919_v33, %v3021_v63  ;;  %v3403_v14 = vpop.eup %2521 }
 0x220   : > { %v3409_v29 = vpop.eup %2523 }
 0x221   : > { %v1119_v23 = vadd.f32 %v3373_v5, %v1118_v35  ;;  %v1044_v24 = vmul.f32 1.442695, %v3932_v18  ;;  %2529 = vpow2.f32 %v1042_v15  ;;  %v3933_v35 = vsub.f32 %v2929_v39, %v3021_v63  ;;  %v3415_v15 = vpop.eup %2525 }
 0x223   : > { %v1120_v21 = vadd.f32 %v3379_v9, %v1119_v23  ;;  %v1046_v30 = vmul.f32 1.442695, %v3933_v35  ;;  %2531 = vpow2.f32 %v1044_v24  ;;  %v3934_v23 = vsub.f32 %v2944_v57, %v3021_v63  ;;  %v3421_v24 = vpop.eup %2527 }
 0x225   : > { %v1121_v27 = vadd.f32 %v3385_v32, %v1120_v21  ;;  %v1048_v49 = vmul.f32 1.442695, %v3934_v23  ;;  %2533 = vpow2.f32 %v1046_v30  ;;  %v3935_v21 = vsub.f32 %v3865_v31, %v3021_v63  ;;  %v3939_v23 = vld [vmem:[#allocation10_spill] sm:$0xff] }
 0x227   : > { %v1122_v36 = vadd.f32 %v3391_v12, %v1121_v27  ;;  %v1050_v61 = vmul.f32 1.442695, %v3935_v21  ;;  %2535 = vpow2.f32 %v1048_v49  ;;  %v3936_v27 = vsub.f32 %v3866_v34, %v3021_v63 }
 0x228   : > { %v3940_v49 = vsub.f32 %v3939_v23, %v3021_v63 }
 0x229   : > { %v1123_v42 = vadd.f32 %v3397_v55, %v1122_v36  ;;  %v1052_v18 = vmul.f32 1.442695, %v3936_v27  ;;  %2537 = vpow2.f32 %v1050_v61  ;;  %v3937_v36 = vld [vmem:[#allocation7_spill] sm:$0xff] }
 0x22a   : > { %v3938_v35 = vsub.f32 %v3937_v36, %v3021_v63 }
 0x22b   : > { %v1124_v33 = vadd.f32 %v3403_v14, %v1123_v42  ;;  %v3427_v42 = vpop.eup %2529  ;;  %2539 = vpow2.f32 %v1052_v18 }
 0x22c   : > { %v1054_v30 = vmul.f32 1.442695, %v3938_v35 }
 0x22d   : > { %v1125_v39 = vadd.f32 %v3409_v29, %v1124_v33  ;;  %v1056_v33 = vmul.f32 1.442695, %v3940_v49  ;;  %v3433_v21 = vpop.eup %2531 }
 0x22e   : > { %2541 = vpow2.f32 %v1054_v30 }
 0x22f   : > { %v1126_v57 = vadd.f32 %v3415_v15, %v1125_v39  ;;  %v3941_v39 = vld [vmem:[#allocation12_spill] sm:$0xff]  ;;  %v3439_v35 = vpop.eup %2533  ;;  %2543 = vpow2.f32 %v1056_v33 }
 0x230   : > { %v3942_v61 = vsub.f32 %v3941_v39, %v3021_v63 }
 0x231   : > { %v1127_v31 = vadd.f32 %v3421_v24, %v1126_v57  ;;  %v3943_v57 = vld [vmem:[#allocation9_spill] sm:$0xff]  ;;  %v3445_v49 = vpop.eup %2535 }
 0x232   : > { %v1058_v27 = vmul.f32 1.442695, %v3942_v61  ;;  %v3944_v18 = vsub.f32 %v3943_v57, %v3021_v63  ;;  %3945 = vst [vmem:[#allocation7_spill] sm:$0xff] %v3445_v49 }
 0x233   : > { %v1128_v34 = vadd.f32 %v3427_v42, %v1127_v31  ;;  %v3946_v31 = vld [vmem:[#allocation11_spill] sm:$0xff]  ;;  %v3451_v61 = vpop.eup %2537 }
 0x234   : > { %v1060_v59 = vmul.f32 1.442695, %v3944_v18  ;;  %2545 = vpow2.f32 %v1058_v27  ;;  %v3947_v30 = vsub.f32 %v3946_v31, %v3021_v63  ;;  %3948 = vst [vmem:[#allocation10_spill] sm:$0xff] %v3451_v61  ;;  %v3952_v27 = vsub.f32 %v3873_v10, %v3021_v63 }
 0x235   : > { %v1129_v36 = vadd.f32 %v3433_v21, %v1128_v34  ;;  %v3949_v34 = vld [vmem:[#allocation14_spill] sm:$0xff]  ;;  %v3457_v18 = vpop.eup %2539 }
 0x236   : > { %v1062_v50 = vmul.f32 1.442695, %v3947_v30  ;;  %2547 = vpow2.f32 %v1060_v59  ;;  %v3950_v33 = vsub.f32 %v3949_v34, %v3021_v63  ;;  %3951 = vst [vmem:[#allocation12_spill] sm:$0xff] %v3457_v18  ;;  %v3954_v59 = vsub.f32 %v3874_v7, %v3021_v63 }
 0x237   : > { %v1130_v23 = vadd.f32 %v3439_v35, %v1129_v36  ;;  %v1066_v36 = vmul.f32 1.442695, %v3952_v27 }
 0x238   : > { %v1064_v38 = vmul.f32 1.442695, %v3950_v33  ;;  %2549 = vpow2.f32 %v1062_v50  ;;  %v3463_v30 = vpop.eup %2541 }
 0x239   : > { %v1131_v39 = vadd.f32 %v3445_v49, %v1130_v23  ;;  %3953 = vst [vmem:[#allocation9_spill] sm:$0xff] %v3463_v30  ;;  %v1068_v23 = vmul.f32 1.442695, %v3954_v59  ;;  %v3469_v33 = vpop.eup %2543 }
 0x23a   : > { %2551 = vpow2.f32 %v1064_v38 }
 0x23b   : > { %v1132_v57 = vadd.f32 %v3451_v61, %v1131_v39  ;;  %2553 = vpow2.f32 %v1066_v36  ;;  %v3955_v39 = vld [vmem:[#allocation15_spill] sm:$0xff] }
 0x23c   : > { %v3956_v50 = vsub.f32 %v3955_v39, %v3021_v63  ;;  %2555 = vpow2.f32 %v1068_v23  ;;  %v3961_v23 = vsub.f32 %v3878_v3, %v3021_v63 }
 0x23d   : > { %v1133_v31 = vadd.f32 %v3457_v18, %v1132_v57  ;;  %v3957_v57 = vld [vmem:[#allocation18_spill] sm:$0xff] }
 0x23e   : > { %v1070_v20 = vmul.f32 1.442695, %v3956_v50  ;;  %v2546_v27 = vpop.eup %2545  ;;  %v3958_v38 = vsub.f32 %v3957_v57, %v3021_v63 }
 0x23f   : > { %v1134_v34 = vadd.f32 %v3463_v30, %v1133_v31  ;;  %v3959_v31 = vld [vmem:[#allocation20_spill] sm:$0xff] }
 0x240   : > { %v1072_v18 = vmul.f32 1.442695, %v3958_v38  ;;  %v3478_v7 = vpop.eup %2547  ;;  %2557 = vpow2.f32 %v1070_v20  ;;  %v3960_v59 = vsub.f32 %v3959_v31, %v3021_v63  ;;  %v3962_v20 = vsub.f32 %v3879_v25, %v3021_v63 }
 0x241   : > { %v1135_v10 = vadd.f32 %v3469_v33, %v1134_v34  ;;  %v1076_v34 = vmul.f32 1.442695, %v3961_v23 }
 0x242   : > { %v1074_v36 = vmul.f32 1.442695, %v3960_v59  ;;  %v3484_v39 = vpop.eup %2549  ;;  %2559 = vpow2.f32 %v1072_v18 }
 0x243   : > { %v1136_v61 = vadd.f32 %v2546_v27, %v1135_v10  ;;  %v1078_v10 = vmul.f32 1.442695, %v3962_v20 }
 0x244   : > { %v3490_v57 = vpop.eup %2551  ;;  %2561 = vpow2.f32 %v1074_v36 }
 0x245   : > { %v1137_v30 = vadd.f32 %v3478_v7, %v1136_v61  ;;  %v3496_v31 = vpop.eup %2553  ;;  %2563 = vpow2.f32 %v1076_v34  ;;  %v3963_v61 = vsub.f32 %v3012_v40, %v3021_v63 }
 0x246   : > { %v3502_v59 = vpop.eup %2555  ;;  %2565 = vpow2.f32 %v1078_v10  ;;  %v3967_v10 = vsub.f32 %v3881_v1, %v3021_v63 }
 0x247   : > { %v1138_v50 = vadd.f32 %v3484_v39, %v1137_v30  ;;  %v1080_v18 = vmul.f32 1.442695, %v3963_v61  ;;  %v3964_v30 = vsub.f32 %v3018_v22, %v3021_v63 }
 0x249   : > { %v1139_v38 = vadd.f32 %v3490_v57, %v1138_v50  ;;  %v1082_v36 = vmul.f32 1.442695, %v3964_v30  ;;  %2567 = vpow2.f32 %v1080_v18  ;;  %v3965_v50 = vld [vmem:[#allocation21_spill] sm:$0xff] }
 0x24a   : > { %v3508_v23 = vpop.eup %2557  ;;  %v3966_v34 = vsub.f32 %v3965_v50, %v3021_v63 }
 0x24b   : > { %v1140_v3 = vadd.f32 %v3496_v31, %v1139_v38  ;;  %2569 = vpow2.f32 %v1082_v36  ;;  %v1086_v38 = vmul.f32 1.442695, %v3967_v10 }
 0x24c   : > { %v1084_v20 = vmul.f32 1.442695, %v3966_v34  ;;  %v3514_v61 = vpop.eup %2559 }
 0x24d   : > { %v1141_v25 = vadd.f32 %v3502_v59, %v1140_v3 }
 0x24e   : > { %v3520_v30 = vpop.eup %2561  ;;  %2571 = vpow2.f32 %v1084_v20 }
 0x24f   : > { %v1142_v40 = vadd.f32 %v3508_v23, %v1141_v25  ;;  %v3523_v3 = vpop.eup %2563  ;;  %2573 = vpow2.f32 %v1086_v38 }
 0x250   : > { %v3526_v25 = vpop.eup %2565 }
 0x251   : > { %v1143_v22 = vadd.f32 %v3514_v61, %v1142_v40 }
 0x253   : > { %v1144_v18 = vadd.f32 %v3520_v30, %v1143_v22  ;;  %v3529_v34 = vpop.eup %2567 }
 0x255   : > { %v1145_v50 = vadd.f32 %v3523_v3, %v1144_v18  ;;  %v3532_v1 = vpop.eup %2569 }
 0x257   : > { %v1146_v36 = vadd.f32 %v3526_v25, %v1145_v50 }
 0x258   : > { %v3535_v40 = vpop.eup %2571 }
 0x259   : > { %v1147_v63 = vadd.f32 %v3529_v34, %v1146_v36  ;;  %v3538_v38 = vpop.eup %2573 }
 0x25b   : > { %v1148_v20 = vadd.f32 %v3532_v1, %v1147_v63 }
 0x25d   : > { %v1149_v10 = vadd.f32 %v3535_v40, %v1148_v20 }
 0x25f   : > { %v1150_v22 = vadd.f32 %v3538_v38, %v1149_v10 }
 0x261   : > { %v1151_v18 = vrot.slane %v1150_v22, 4 }
 0x263   : > { %v1152_v49 = vadd.f32 %v1151_v18, %v1150_v22 }
 0x265   : > { %v1153_v50 = vrot.slane %v1152_v49, 2 }
 0x267   : > { %v1154_v28 = vadd.f32 %v1153_v50, %v1152_v49 }
 0x269   : > { %v1155_v52 = vrot.slane %v1154_v28, 1 }
 0x26b   : > { %v1156_v41 = vadd.f32 %v1155_v52, %v1154_v28 }
 0x26d   : > { %2575 = vrcp.f32 %v1156_v41 }
 0x277   : > { %v3545_v36 = vpop.eup %2575 }
 0x278   : > { %v1174_v63 = vmul.f32 %v3545_v36, %v3268_v13  ;;  %v1175_v20 = vmul.f32 %v3545_v36, %v3274_v47  ;;  %v1206_v10 = vmul.f32 %v3545_v36, %v3469_v33  ;;  %v1207_v49 = vmul.f32 %v3545_v36, %v2546_v27 }
 0x279   : > { %v1158_v52 = vmul.f32 %v3545_v36, %v3172_v16  ;;  %v1159_v28 = vmul.f32 %v3545_v36, %v3174_v19  ;;  %v1190_v41 = vmul.f32 %v3545_v36, %v3373_v5  ;;  %v1191_v13 = vmul.f32 %v3545_v36, %v3379_v9 }
 0x27a   : > { %v1230_v22 = vpack.c.bf16 %v1175_v20, %v1174_v63  ;;  %v1246_v18 = vpack.c.bf16 %v1207_v49, %v1206_v10  ;;  %v1176_v47 = vmul.f32 %v3545_v36, %v3280_v62  ;;  %v1177_v33 = vmul.f32 %v3545_v36, %v3286_v56 }
 0x27b   : > { %v1222_v27 = vpack.c.bf16 %v1159_v28, %v1158_v52  ;;  %v1238_v50 = vpack.c.bf16 %v1191_v13, %v1190_v41  ;;  %v1208_v16 = vmul.f32 %v3545_v36, %v3478_v7  ;;  %v1209_v19 = vmul.f32 %v3545_v36, %v3484_v39 }
 0x27c   : > { %2200 = vst [vmem:[%s3570_s17 + $0x40] sm:$0xff] %v1230_v22   ;;  %2258 = vmatprep.subr.bf16.mxu0 %v1230_v22  ;;  %2216 = vst [vmem:[%s3570_s17 + $0xc0] sm:$0xff] %v1246_v18   ;;  %2280 = vmatprep.subr.bf16.mxu1 %v1246_v18  ;;  %v1231_v62 = vpack.c.bf16 %v1177_v33, %v1176_v47  ;;  %v1160_v56 = vmul.f32 %v3545_v36, %v3184_v53 }
 0x27d   : > { %v1161_v5 = vmul.f32 %v3545_v36, %v3190_v45  ;;  %2037 = vst [vmem:[%s3570_s17] sm:$0xff] %v1222_v27   ;;  %2259 = vmatpush3.bf16.msra.mxu0 %v1222_v27  ;;  %2208 = vst [vmem:[%s3570_s17 + $0x80] sm:$0xff] %v1238_v50   ;;  %2281 = vmatpush3.bf16.msra.mxu1 %v1238_v50  ;;  %v1247_v9 = vpack.c.bf16 %v1209_v19, %v1208_v16 }
 0x27e   : > { %v1192_v7 = vmul.f32 %v3545_v36, %v3385_v32  ;;  %v1193_v39 = vmul.f32 %v3545_v36, %v3391_v12  ;;  %2201 = vst [vmem:[%s3570_s17 + $0x48] sm:$0xff] %v1231_v62   ;;  %2260 = vmatprep.subr.bf16.mxu0 %v1231_v62  ;;  %v1178_v53 = vmul.f32 %v3545_v36, %v3292_v60 }
 0x27f   : > { %v1223_v63 = vpack.c.bf16 %v1161_v5, %v1160_v56  ;;  %v1179_v45 = vmul.f32 %v3545_v36, %v3298_v2  ;;  %v1210_v20 = vmul.f32 %v3545_v36, %v3490_v57  ;;  %2217 = vst [vmem:[%s3570_s17 + $0xc8] sm:$0xff] %v1247_v9   ;;  %2282 = vmatprep.subr.bf16.mxu1 %v1247_v9  ;;  %v3968_v56 = vld [vmem:[#allocation17_spill] sm:$0xff]  ;;  %v3969_v9 = vld [vmem:[#allocation8_spill] sm:$0xff] }
 0x280   : > { %v1239_v32 = vpack.c.bf16 %v1193_v39, %v1192_v7  ;;  %v1211_v12 = vmul.f32 %v3545_v36, %v3496_v31  ;;  %v1162_v10 = vmul.f32 %v3545_v36, %v3196_v37  ;;  %v1163_v49 = vmul.f32 %v3545_v36, %v3202_v46 }
 0x281   : > { %2193 = vst [vmem:[%s3570_s17 + $0x8] sm:$0xff] %v1223_v63   ;;  %v1232_v60 = vpack.c.bf16 %v1179_v45, %v1178_v53  ;;  %v1194_v2 = vmul.f32 %v3545_v36, %v3397_v55  ;;  %v1195_v57 = vmul.f32 %v3545_v36, %v3403_v14  ;;  %v1180_v52 = vmul.f32 %v3545_v36, %v3304_v6  ;;  %v3971_v53 = vld [vmem:[#allocation7_spill] sm:$0xff] }
 0x282   : > { %2261 = vmatpush3.bf16.msra.mxu0 %v1223_v63  ;;  %2209 = vst [vmem:[%s3570_s17 + $0x88] sm:$0xff] %v1239_v32   ;;  %2283 = vmatpush3.bf16.msra.mxu1 %v1239_v32  ;;  %v1248_v37 = vpack.c.bf16 %v1211_v12, %v1210_v20  ;;  %v1224_v31 = vpack.c.bf16 %v1163_v49, %v1162_v10  ;;  %v3972_v20 = vld [vmem:[#allocation10_spill] sm:$0xff]  ;;  %v3973_v12 = vld [vmem:[#allocation19_spill] sm:$0xff] }
 0x283   : > { %v1181_v46 = vmul.f32 %v3545_v36, %v3310_v0  ;;  %2202 = vst [vmem:[%s3570_s17 + $0x50] sm:$0xff] %v1232_v60   ;;  %2262 = vmatprep.subr.bf16.mxu0 %v1232_v60  ;;  %v1240_v28 = vpack.c.bf16 %v1195_v57, %v1194_v2  ;;  %v1212_v55 = vmul.f32 %v3545_v36, %v3502_v59  ;;  %v3974_v49 = vld [vmem:[#allocation22_spill] sm:$0xff] }
 0x284   : > { %v1213_v14 = vmul.f32 %v3545_v36, %v3508_v23  ;;  %v1164_v6 = vmul.f32 %v3545_v36, %v3208_v54  ;;  %2218 = vst [vmem:[%s3570_s17 + $0xd0] sm:$0xff] %v1248_v37   ;;  %2284 = vmatprep.subr.bf16.mxu1 %v1248_v37  ;;  %2194 = vst [vmem:[%s3570_s17 + $0x10] sm:$0xff] %v1224_v31   ;;  %v1165_v0 = vmul.f32 %v3545_v36, %v3214_v43  ;;  %v3975_v37 = vld [vmem:[#allocation16_spill] sm:$0xff] }
 0x285   : > { %v1233_v41 = vpack.c.bf16 %v1181_v46, %v1180_v52  ;;  %v1196_v13 = vmul.f32 %v3545_v36, %v3409_v29  ;;  %v1197_v59 = vmul.f32 %v3545_v36, %v3415_v15  ;;  %2210 = vst [vmem:[%s3570_s17 + $0x90] sm:$0xff] %v1240_v28   ;;  %v1182_v54 = vmul.f32 %v3545_v36, %v3316_v4  ;;  %v3976_v46 = vld [vmem:[#allocation13_spill] sm:$0xff] }
 0x286   : > { %v1249_v23 = vpack.c.bf16 %v1213_v14, %v1212_v55  ;;  %v1183_v22 = vmul.f32 %v3545_v36, %v3322_v11  ;;  %v1214_v18 = vmul.f32 %v3545_v36, %v3514_v61  ;;  %2263 = vmatpush3.bf16.msra.mxu0 %v1224_v31  ;;  %2285 = vmatpush3.bf16.msra.mxu1 %v1240_v28  ;;  %v3977_v55 = vld [vmem:[#allocation12_spill] sm:$0xff] }
 0x287   : > { %2203 = vst [vmem:[%s3570_s17 + $0x58] sm:$0xff] %v1233_v41   ;;  %v1225_v43 = vpack.c.bf16 %v1165_v0, %v1164_v6  ;;  %v1241_v29 = vpack.c.bf16 %v1197_v59, %v1196_v13  ;;  %v1215_v15 = vmul.f32 %v3545_v36, %v3520_v30  ;;  %2264 = vmatprep.subr.bf16.mxu0 %v1233_v41  ;;  %v3978_v6 = vld [vmem:[#allocation9_spill] sm:$0xff]  ;;  %v1542_v59 = vld [vmem:[%s3341_s16] sm:$0xff] }
 0x288   : > { %2219 = vst [vmem:[%s3570_s17 + $0xd8] sm:$0xff] %v1249_v23   ;;  %2286 = vmatprep.subr.bf16.mxu1 %v1249_v23  ;;  %v1234_v4 = vpack.c.bf16 %v1183_v22, %v1182_v54  ;;  %v1166_v11 = vmul.f32 %v3545_v36, %v3220_v58  ;;  %v1167_v61 = vmul.f32 %v3545_v36, %v3226_v44  ;;  %v1544_v23 = vld [vmem:[%s3341_s16 + $0x10] sm:$0xff]  ;;  %v1630_v22 = vld [vmem:[%s327_s9] sm:$0xf]  ;;  %s1649_s16 = sadd.s32 %s2655_s21, %s1961_s15  ;;  %s2581_s9 = sshll.u32 %s2673_s8, 4  ;;  %s2582_s9 = int_to_ptr.vmem [resolvable:$false] %s2581_s9 }
 0x289   : > { %2195 = vst [vmem:[%s3570_s17 + $0x18] sm:$0xff] %v1225_v43   ;;  %2211 = vst [vmem:[%s3570_s17 + $0x98] sm:$0xff] %v1241_v29   ;;  %v1250_v47 = vpack.c.bf16 %v1215_v15, %v1214_v18  ;;  %v1198_v33 = vmul.f32 %v3545_v36, %v3421_v24  ;;  %v1199_v30 = vmul.f32 %v3545_v36, %v3427_v42  ;;  %s1962_s0 = sshll.u32 %s1649_s16, 6  ;;  %p2584_p4 = scmp.lt.s32.totalorder %s3721_s14, %s2582_s9 }
 0x28a   : > { %v1184_v27 = vmul.f32 %v3545_v36, %v3328_v17  ;;  %2204 = vst [vmem:[%s3570_s17 + $0x60] sm:$0xff] %v1234_v4   ;;  %v1226_v50 = vpack.c.bf16 %v1167_v61, %v1166_v11  ;;  %v1185_v58 = vmul.f32 %v3545_v36, %v3334_v8  ;;  %v1216_v44 = vmul.f32 %v3545_v36, %v3523_v3  ;;  %s3726_s27 = scalar_lea.hbm %s3794_s4, %s1962_s0 }
 0x28b   : > { %v1217_v16 = vmul.f32 %v3545_v36, %v3526_v25  ;;  %2265 = vmatpush3.bf16.msra.mxu0 %v1225_v43  ;;  %2287 = vmatpush3.bf16.msra.mxu1 %v1241_v29  ;;  %2220 = vst [vmem:[%s3570_s17 + $0xe0] sm:$0xff] %v1250_v47   ;;  %v1242_v24 = vpack.c.bf16 %v1199_v30, %v1198_v33  ;;  %1632 = vst [vmem:[%s3715_s13 + $0x8] sm:$0xf] %v1630_v22 }
 0x28c   : > { %v1168_v17 = vmul.f32 %v3545_v36, %v3232_v51  ;;  %v1169_v42 = vmul.f32 %v3545_v36, %v3238_v48  ;;  %2266 = vmatprep.subr.bf16.mxu0 %v1234_v4  ;;  %2288 = vmatprep.subr.bf16.mxu1 %v1250_v47  ;;  %2196 = vst [vmem:[%s3570_s17 + $0x20] sm:$0xff] %v1226_v50  }
 0x28d   : > { %v1235_v8 = vpack.c.bf16 %v1185_v58, %v1184_v27  ;;  %v1251_v3 = vpack.c.bf16 %v1217_v16, %v1216_v44  ;;  %v1200_v25 = vmul.f32 %v3545_v36, %v3433_v21  ;;  %2212 = vst [vmem:[%s3570_s17 + $0xa0] sm:$0xff] %v1242_v24   ;;  %v1201_v62 = vmul.f32 %v3545_v36, %v3439_v35  ;;  %v3970_v35 = vld [vmem:[#allocation6_spill] sm:$0xff] }
 0x28e   : > { %v1227_v19 = vpack.c.bf16 %v1169_v42, %v1168_v17  ;;  %v1186_v51 = vmul.f32 %v3545_v36, %v3347_v26  ;;  %v1187_v48 = vmul.f32 %v3545_v36, %v3968_v56  ;;  %v1218_v5 = vmul.f32 %v3545_v36, %v3529_v34 }
 0x28f   : > { %2205 = vst [vmem:[%s3570_s17 + $0x68] sm:$0xff] %v1235_v8   ;;  %2221 = vst [vmem:[%s3570_s17 + $0xe8] sm:$0xff] %v1251_v3   ;;  %v1219_v21 = vmul.f32 %v3545_v36, %v3532_v1  ;;  %v1170_v7 = vmul.f32 %v3545_v36, %v3969_v9  ;;  %v1171_v39 = vmul.f32 %v3545_v36, %v3970_v35  ;;  %2267 = vmatpush3.bf16.msra.mxu0 %v1226_v50 }
 0x290   : > { %2289 = vmatpush3.bf16.msra.mxu1 %v1242_v24  ;;  %2197 = vst [vmem:[%s3570_s17 + $0x28] sm:$0xff] %v1227_v19   ;;  %v1243_v26 = vpack.c.bf16 %v1201_v62, %v1200_v25  ;;  %v1236_v63 = vpack.c.bf16 %v1187_v48, %v1186_v51  ;;  %v1202_v34 = vmul.f32 %v3545_v36, %v3971_v53 }
 0x291   : > { %2268 = vmatprep.subr.bf16.mxu0 %v1235_v8  ;;  %2290 = vmatprep.subr.bf16.mxu1 %v1251_v3  ;;  %v1252_v45 = vpack.c.bf16 %v1219_v21, %v1218_v5  ;;  %v1228_v1 = vpack.c.bf16 %v1171_v39, %v1170_v7  ;;  %v1203_v32 = vmul.f32 %v3545_v36, %v3972_v20 }
 0x292   : > { %2213 = vst [vmem:[%s3570_s17 + $0xa8] sm:$0xff] %v1243_v26   ;;  %2206 = vst [vmem:[%s3570_s17 + $0x70] sm:$0xff] %v1236_v63   ;;  %v1188_v10 = vmul.f32 %v3545_v36, %v3973_v12  ;;  %v1189_v60 = vmul.f32 %v3545_v36, %v3974_v49  ;;  %v1220_v2 = vmul.f32 %v3545_v36, %v3535_v40 }
 0x293   : > { %v1221_v57 = vmul.f32 %v3545_v36, %v3538_v38  ;;  %2222 = vst [vmem:[%s3570_s17 + $0xf0] sm:$0xff] %v1252_v45   ;;  %2198 = vst [vmem:[%s3570_s17 + $0x30] sm:$0xff] %v1228_v1   ;;  %v1244_v52 = vpack.c.bf16 %v1203_v32, %v1202_v34  ;;  %v1172_v31 = vmul.f32 %v3545_v36, %v3975_v37  ;;  %2269 = vmatpush3.bf16.msra.mxu0 %v1227_v19 }
 0x294   : > { %v1173_v28 = vmul.f32 %v3545_v36, %v3976_v46  ;;  %v1204_v40 = vmul.f32 %v3545_v36, %v3977_v55  ;;  %2291 = vmatpush3.bf16.msra.mxu1 %v1243_v26  ;;  %v1237_v38 = vpack.c.bf16 %v1189_v60, %v1188_v10  ;;  %v1205_v41 = vmul.f32 %v3545_v36, %v3978_v6 }
 0x295   : > { %v1253_v14 = vpack.c.bf16 %v1221_v57, %v1220_v2  ;;  %2270 = vmatprep.subr.bf16.mxu0 %v1236_v63  ;;  %2292 = vmatprep.subr.bf16.mxu1 %v1252_v45  ;;  %2214 = vst [vmem:[%s3570_s17 + $0xb0] sm:$0xff] %v1244_v52   ;;  %v1546_v36 = vpack.c.bf16 %v1542_v59, %v1542_v59 }
 0x296   : > { %v1229_v0 = vpack.c.bf16 %v1173_v28, %v1172_v31  ;;  %2207 = vst [vmem:[%s3570_s17 + $0x78] sm:$0xff] %v1237_v38   ;;  %v1245_v13 = vpack.c.bf16 %v1205_v41, %v1204_v40  ;;  %v1548_v54 = vpack.c.bf16 %v1544_v23, %v1544_v23 }
 0x297   : > { %2223 = vst [vmem:[%s3570_s17 + $0xf8] sm:$0xff] %v1253_v14   ;;  %2271 = vmatpush3.bf16.msra.mxu0 %v1228_v1 }
 0x298   : > { %2199 = vst [vmem:[%s3570_s17 + $0x38] sm:$0xff] %v1229_v0   ;;  %2293 = vmatpush3.bf16.msra.mxu1 %v1244_v52  ;;  %2215 = vst [vmem:[%s3570_s17 + $0xb8] sm:$0xff] %v1245_v13   ;;  %2272 = vmatprep.subr.bf16.mxu0 %v1237_v38  ;;  %s2583_s17 = scalar_lea.vmem %s2582_s9, 8192 }
 0x299   : > { %2294 = vmatprep.subr.bf16.mxu1 %v1253_v14  ;;  %p2585_p5 = scmp.lt.s32.totalorder %s2583_s17, %s2577_s30 }
 0x29b   : > { %2273 = vmatpush3.bf16.msra.mxu0 %v1229_v0  ;;  %p2586_p6 = por %p2585_p5, %p2584_p4 }
 0x29c   : > { %2295 = vmatpush3.bf16.msra.mxu1 %v1245_v13 }
 0x29d   : > { %p2587_p7 = pnand %p2586_p6, %p2580_p2 }
 0x29e   : > { %1583 = vmatmul.mubr.bf16.vlgmr.msra.gmra.mrb[32].mxu0 %v1546_v36 }
 0x29f   : > { %1623 = vmatmul.mubr.bf16.vlgmr.msra.gmra.mrb[32].mxu1 %v1548_v54 }
 0x2a0   : > { %2590 = shalt.err (!%p2587_p7)
}
 0x2a1   : > { %s2591_s0 = scalar_lea.hbm %s3726_s27, 4096  ;;  %s2595_s10 = scalar_lea.hbm %s3794_s4, 16384 }
 0x2a2   : > { %p2592_p9 = scmp.ne.s32.totalorder %s3726_s27, %s2591_s0  ;;  %p2596_p12 = scmp.lt.u32.totalorder %s3726_s27, %s3794_s4 }
 0x2a3   : > { %p2597_p13 = scmp.lt.u32.totalorder %s2595_s10, %s2591_s0  ;;  %p2599_p1 = scmp.lt.u32.totalorder %s2591_s0, %s3726_s27 }
 0x2a4   : > { %p2593_p10 = pnand %p2592_p9, %p2758_p3 }
 0x2a5   : > { %p2598_p0 = por %p2597_p13, %p2596_p12 }
 0x2a6   : > { %p2594_p11 = pneg %p2593_p10 }
 0x2a7   : > { %p2600_p2 = por %p2599_p1, %p2598_p0 }
 0x2a9   : > { %p2601_p4 = pnand %p2600_p2, %p2594_p11 }
 0x2ab   : > { %2604 = shalt.err (!%p2601_p4)
}
 0x2ac   : > { %s2674_s30 = smov 64   ;;  %s2675_s8 = smov 128   ;;  %v1697_v58 = vld [vmem:[%s3715_s13 + $0x8] sm:$0xff] (%p2758_p3) }
 0x2ad   : > { %s2676_s9 = smov 4   ;;  %s1963_s12 = sshll.u32 (%p2758_p3), %s2659_s22, 2 }
 0x2ae   : > { %2372 = dma.vmem_to_hbm [thread:$0]  (%p2758_p3), %s3721_s14, 4096, %s3726_s27, %s1634_s26, %s2674_s30, %s2675_s8, %s2676_s9  }
 0x2af   : > { %s1663_s14 = sadd.s32 (%p2758_p3), %s2655_s21, %s1963_s12 }
 0x2b0   : > { %s1964_s27 = sshll.u32 (%p2758_p3), %s1663_s14, 3 }
 0x2b1   : > { %s1665_s0 = scalar_lea.vmem (%p2758_p3), %s3795_s5, %s1964_s27 }
 0x2b2   : > { %1698 = vst [vmem:[%s1665_s0 + $0x10] sm:$0xff] (%p2758_p3), %v1697_v58 }
 0x371   : > { %v2274_v18 = vpop.f32.mrb[32].mxu0 }
 0x372   : > { %v2296_v43 = vpop.f32.mrb[32].mxu1  ;;  %v2275_v29 = vpop.f32.mrb[33].mxu0  ;;  %1661 = sbr.rel (!%p2758_p3) target bundleno = 897 (0x381), region = 44 }
 0x373   : > { %v2297_v15 = vpop.f32.mrb[33].mxu1  ;;  %v2276_v4 = vadd.f32 %v2275_v29, %v2274_v18  ;;  %v2277_v61 = vpop.f32.mrb[34].mxu0 }
 0x374   : > { %v2298_v11 = vadd.f32 %v2297_v15, %v2296_v43  ;;  %v2299_v47 = vpop.f32.mrb[34].mxu1  ;;  %v2278_v33 = vpop.f32.mrb[35].mxu0 }
 0x375   : > { %v2300_v30 = vpop.f32.mrb[35].mxu1 }
 0x376   : > { %v1625_v27 = vadd.f32 %v2298_v11, %v2276_v4 }
 0x378   : > { %1631 = vst [vmem:[%s3715_s13] sm:$0xff] %v1625_v27 }
 0x37f   : > { %v1695_v50 = vld [vmem:[%s3715_s13] sm:$0xff] }
 0x380   : > { %1696 = vst [vmem:[%s1665_s0] sm:$0xff] %v1695_v50 }
 0x381 PF: > { %p2378_p3 = scmp.ge.s32.totalorder %s2671_s25, 2  ;;  %s1710_s6 = sand.u32 1, %s2643_s18  }
 0x382   : > { %s1711_s22 = scalar_lea.sflag [#allocation3], %s1710_s6 }
 0x383   : > { %p2375_p5 = pnand %p2378_p3, %p2767_p8 }
 0x385   : > { %2638 = dma.done.wait (!%p2375_p5), %s1711_s22, 4096  }
 0x386   : > { %2640 = vsyncadd (!%p2375_p5), %s1711_s22, 4294963200  ;;  %s19_s25 = sadd.s32 1, %s2671_s25   ;;  %s3979_s18 = smov %s2647_s19 }
 0x387   : > { %p16_p6 = scmp.ge.s32.totalorder %s19_s25, 6   ;;  %s3980_s19 = smov %s2651_s20 }
 0x388   : > { %s3981_s20 = smov %s2776_s11  ;;  %s3982_s21 = smov %s2663_s23 }
 0x389   : > { %s3983_s22 = smov %s2667_s24  ;;  %s3984_s23 = smov %s3987_s28 }
 0x38a   : > { %s3985_s24 = smov %s3991_s29  ;;  %18 = sbr.rel (!%p16_p6) target bundleno = 9 (0x9), region = 130 }
 0x391   :  { %1723 = vsyncpa [#allocation3], 1 }
 0x392   :  { %1725 = vsyncpa [#allocation3 + $0x1], 1 }

</bundles_post_ra>
